<compile_context>
chip_gen: v7x
topology: tpu7x:2x2x1
jax: 0.10.0
libtpu: 0.0.40
codegen_flags: <defaults>
</compile_context>

<pallas_src>
import jax
import jax.numpy as jnp
from jax.experimental import pallas as pl
from jax.experimental.pallas import tpu as pltpu

_LANES = 128       # vreg lane width
_TR_CAP = 1024     # max sublane-rows per tile: 1024*128*4 B = 512 KiB / buffer


def _round_up(a: int, b: int) -> int:
    return ((a + b - 1) // b) * b


def _fused_affine_kernel(coef_ref, x_ref, o_ref):
    """Interleaved-layout fused affine map (pure VPU/XLU, one HBM pass).

    Flattened input is [x(0,0), x(0,1), x(1,0), x(1,1), ...]: lane parity is
    the feature index.  128 is even, so every (feature-0, feature-1) pair sits
    on adjacent lanes of the same row; a per-row lane rotate fetches the
    partner feature (wrapped values are never selected by the parity mask).

    coef_ref : SMEM (6,) f32 = [Aeff00, Aeff11, Aeff10, Aeff01, beff0, beff1]
    x_ref    : VMEM (TR, 128) f32, natural interleaved layout
    o_ref    : VMEM (TR, 128) f32
    """
    x = x_ref[...]
    lane = jax.lax.broadcasted_iota(jnp.int32, x.shape, 1)
    even = (lane & 1) == 0
    x_next = pltpu.roll(x, 127, 1)    # x[:, (l+1) % 128]  (== shift -1)
    x_prev = pltpu.roll(x, 1, 1)      # x[:, (l-1) % 128]
    x_other = jnp.where(even, x_next, x_prev)      # partner feature of the pair
    c_self = jnp.where(even, coef_ref[0], coef_ref[1])
    c_other = jnp.where(even, coef_ref[2], coef_ref[3])
    c_bias = jnp.where(even, coef_ref[4], coef_ref[5])
    o_ref[...] = x * c_self + x_other * c_other + c_bias


def model_forward(x, weight, bias):
    """x: (B, S, D) f32; weight: (D, D) torch layout (out, in); bias: (D,). D == 2."""
    B, S, D = x.shape
    assert weight.shape == (D, D) and bias.shape == (D,)
    assert D == 2, "interleaved fast path is specialized for the module's D=2"

    # Fuse the two shared-weight linears once (outside the kernel).
    # Note: this changes FP rounding order vs. the literal reference; fine at
    # 1e-5 in f32 for this module.
    A = weight.T.astype(jnp.float32)                 # (2, 2) == W^T
    A_eff = A + A @ A                                # out = x @ A_eff + b_eff
    b = bias.astype(jnp.float32)
    b_eff = 2.0 * b + b @ A
    # Per-lane-parity coefficients: [self_even, self_odd, other_even, other_odd,
    #                                bias_even, bias_odd]
    coef = jnp.stack([A_eff[0, 0], A_eff[1, 1], A_eff[1, 0], A_eff[0, 1],
                      b_eff[0], b_eff[1]]).astype(jnp.float32)

    # Natural interleaved layout: flatten (free for a contiguous array) and
    # view as (rows, 128).  Pads only when N is not 128-aligned (<=127 elems).
    N = B * S * D
    x_flat = x.reshape(N).astype(jnp.float32)
    R = pl.cdiv(N, _LANES)
    N_pad = R * _LANES
    if N_pad != N:
        x_flat = jnp.pad(x_flat, (0, N_pad - N))
    x2d = x_flat.reshape(R, _LANES)

    # Row tiling: big tiles to amortize the ~0.35us per-step overhead, but keep
    # >=4 grid steps when possible so both v7x TensorCores get work.  The row
    # axis is not padded: Pallas masks the partial edge block (pl.cdiv grid).
    if R <= 8:
        TR = R                       # block rows == full array rows (allowed)
    else:
        TR = max(8, min(_TR_CAP, _round_up(pl.cdiv(R, 4), 8)))
    grid = (pl.cdiv(R, TR),)

    out2d = pl.pallas_call(
        _fused_affine_kernel,
        out_shape=jax.ShapeDtypeStruct((R, _LANES), jnp.float32),
        grid=grid,
        in_specs=[
            pl.BlockSpec(memory_space=pltpu.MemorySpace.SMEM),   # coef (6,)
            pl.BlockSpec((TR, _LANES), lambda i: (i, 0)),        # x tile
        ],
        out_specs=pl.BlockSpec((TR, _LANES), lambda i: (i, 0)),
        compiler_params=pltpu.CompilerParams(
            dimension_semantics=("parallel",)),
    )(coef, x2d)

    out_flat = out2d.reshape(N_pad)
    if N_pad != N:
        out_flat = out_flat[:N]
    # TODO(synk): v3 = v2.permute(0, 2, 1) in the original module is dead code
    # (never used / returned) and is intentionally dropped.
    return out_flat.reshape(B, S, D).astype(x.dtype)


def _reference(x, weight, bias):
    v1 = x @ weight.T + bias
    v2 = v1 @ weight.T + bias
    # v3 = v2.permute(0, 2, 1)   # dead code in the original module
    return v1 + v2


if __name__ == "__main__":
    key = jax.random.PRNGKey(0)
    k_x, k_w, k_b, k_x2, k_x3 = jax.random.split(key, 5)

    # Shapes consistent with the module's forward: x1 = randn(1, 1, 2)
    B, S, D = 1, 1, 2
    x1 = jax.random.normal(k_x, (B, S, D), dtype=jnp.float32)

    # torch.nn.Linear default init: U(-1/sqrt(fan_in), 1/sqrt(fan_in))
    bound = 1.0 / (D ** 0.5)
    weight = jax.random.uniform(k_w, (D, D), jnp.float32, -bound, bound)
    bias = jax.random.uniform(k_b, (D,), jnp.float32, -bound, bound)

    out = jax.block_until_ready(model_forward(x1, weight, bias))
    ref = _reference(x1, weight, bias)
    assert out.shape == (B, S, D)
    assert jnp.allclose(out, ref, atol=1e-5, rtol=1e-5)

    # Larger, 128-unaligned flat length: exercises multi-step grid, the
    # masked partial edge block, and the pad/slice fallback.
    x2 = jax.random.normal(k_x2, (2, 10000, D), dtype=jnp.float32)
    out2 = jax.block_until_ready(model_forward(x2, weight, bias))
    assert out2.shape == (2, 10000, D)
    assert jnp.allclose(out2, _reference(x2, weight, bias), atol=1e-5, rtol=1e-5)

    # 128-aligned flat length: zero-copy path (no pad, no slice, free reshapes).
    x3 = jax.random.normal(k_x3, (2, 8192, D), dtype=jnp.float32)
    out3 = jax.block_until_ready(model_forward(x3, weight, bias))
    assert jnp.allclose(out3, _reference(x3, weight, bias), atol=1e-5, rtol=1e-5)

    print("KERNEL_OK")
</pallas_src>

<mosaic_0001>
module attributes {stable_mosaic.version = 11 : i64} {
  func.func @_fused_affine_kernel(%arg0: i32, %arg1: memref<6xf32, #tpu.memory_space<smem>>, %arg2: memref<1x128xf32, #tpu.memory_space<vmem>>, %arg3: memref<1x128xf32, #tpu.memory_space<vmem>>) attributes {dimension_semantics = [#tpu.dimension_semantics<parallel>], iteration_bounds = array<i64: 1>, scalar_prefetch = 0 : i64, scratch_operands = 0 : i64, tpu.core_type = #tpu.core_type<tc>, window_params = [{transform_indices = @transform_0, window_bounds = array<i64: 6>}, {transform_indices = @transform_1, window_bounds = array<i64: 1, 128>}, {transform_indices = @transform_2, window_bounds = array<i64: 1, 128>}]} {
    %c0 = arith.constant 0 : index
    %c0_0 = arith.constant 0 : index
    %0 = vector.load %arg2[%c0, %c0_0] : memref<1x128xf32, #tpu.memory_space<vmem>>, vector<1x128xf32>
    %1 = tpu.iota {dimensions = array<i32: 1>} : vector<1x128xi32>
    %c1_i32 = arith.constant 1 : i32
    %2 = vector.broadcast %c1_i32 : i32 to vector<1x128xi32>
    %3 = arith.andi %1, %2 : vector<1x128xi32>
    %c0_i32 = arith.constant 0 : i32
    %4 = vector.broadcast %c0_i32 : i32 to vector<1x128xi32>
    %5 = arith.cmpi eq, %3, %4 : vector<1x128xi32>
    %c127_i32 = arith.constant 127 : i32
    %6 = tpu.dynamic_rotate %0 by %c127_i32 dim 1 : vector<1x128xf32>, i32 -> vector<1x128xf32>
    %c1_i32_1 = arith.constant 1 : i32
    %7 = tpu.dynamic_rotate %0 by %c1_i32_1 dim 1 : vector<1x128xf32>, i32 -> vector<1x128xf32>
    %8 = arith.select %5, %6, %7 : vector<1x128xi1>, vector<1x128xf32>
    %c0_2 = arith.constant 0 : index
    %9 = memref.load %arg1[%c0_2] : memref<6xf32, #tpu.memory_space<smem>>
    %c1 = arith.constant 1 : index
    %10 = memref.load %arg1[%c1] : memref<6xf32, #tpu.memory_space<smem>>
    %11 = vector.broadcast %9 : f32 to vector<1x128xf32>
    %12 = vector.broadcast %10 : f32 to vector<1x128xf32>
    %13 = arith.select %5, %11, %12 : vector<1x128xi1>, vector<1x128xf32>
    %c2 = arith.constant 2 : index
    %14 = memref.load %arg1[%c2] : memref<6xf32, #tpu.memory_space<smem>>
    %c3 = arith.constant 3 : index
    %15 = memref.load %arg1[%c3] : memref<6xf32, #tpu.memory_space<smem>>
    %16 = vector.broadcast %14 : f32 to vector<1x128xf32>
    %17 = vector.broadcast %15 : f32 to vector<1x128xf32>
    %18 = arith.select %5, %16, %17 : vector<1x128xi1>, vector<1x128xf32>
    %c4 = arith.constant 4 : index
    %19 = memref.load %arg1[%c4] : memref<6xf32, #tpu.memory_space<smem>>
    %c5 = arith.constant 5 : index
    %20 = memref.load %arg1[%c5] : memref<6xf32, #tpu.memory_space<smem>>
    %21 = vector.broadcast %19 : f32 to vector<1x128xf32>
    %22 = vector.broadcast %20 : f32 to vector<1x128xf32>
    %23 = arith.select %5, %21, %22 : vector<1x128xi1>, vector<1x128xf32>
    %24 = arith.mulf %0, %13 : vector<1x128xf32>
    %25 = arith.mulf %8, %18 : vector<1x128xf32>
    %26 = arith.addf %24, %25 : vector<1x128xf32>
    %27 = arith.addf %26, %23 : vector<1x128xf32>
    %c0_3 = arith.constant 0 : index
    %c0_4 = arith.constant 0 : index
    %28 = vector.load %arg3[%c0_3, %c0_4] : memref<1x128xf32, #tpu.memory_space<vmem>>, vector<1x128xf32>
    tpu.vector_store %arg3[%c0_3, %c0_4], %27 {strides = array<i32>} : memref<1x128xf32, #tpu.memory_space<vmem>>, vector<1x128xf32>,
    return
  }
  func.func @transform_0(%arg0: i32) -> i32 {
    %c0_i32 = arith.constant 0 : i32
    %c0_i32_0 = arith.constant 0 : i32
    return %c0_i32 : i32
  }
  func.func @transform_1(%arg0: i32) -> (i32, i32) {
    %c0_i32 = arith.constant 0 : i32
    %c0_i32_0 = arith.constant 0 : i32
    return %arg0, %c0_i32 : i32, i32
  }
  func.func @transform_2(%arg0: i32) -> (i32, i32) {
    %c0_i32 = arith.constant 0 : i32
    %c0_i32_0 = arith.constant 0 : i32
    return %arg0, %c0_i32 : i32, i32
  }
}

</mosaic_0001>

<bundles_post_ra>
// kernel: tpu_custom_call.1
= control target key start
LH: loop header
LB: loop body
LE: loop exit
PB: predicated region body
PF: predicated region fallthrough
CT: control target
= control target key end

     0   :  { %7 = vsyncpa [#allocation4], 0  ;;  %s159_s0 = inlined_call_operand.hbm [shape: f32[6], index: 0, kind: input, shape index: {}]   ;;  %s160_s1 = inlined_call_operand.vmem [shape: f32[1,128], index: 1, kind: input, shape index: {}]   ;;  %s161_s2 = inlined_call_operand.hbm [shape: f32[1,128], index: 2, kind: output, shape index: {}]  }
   0x1   :  { %8 = vsyncpa [#allocation3], 0  ;;  %s77_s11 = scalar_lea.hbm %s159_s0, 16 }
   0x2   :  { %p78_p0 = scmp.ne.s32.totalorder %s159_s0, %s77_s11  ;;  %p81_p1 = scmp.lt.u32.totalorder %s77_s11, %s159_s0 }
   0x4   :  { %p83_p2 = pnand %p81_p1, %p78_p0 }
   0x6   :  { %86 = shalt.err (!%p83_p2)
}
   0x7   :  { %s113_s16 = smov [#allocation2]  }
   0x8   :  { %16 = dma.hbm_to_smem %s159_s0, 16, %s113_s16, [#allocation4]  }
   0x9   :  { %109 = dma.done.wait [#allocation4], 16  }
   0xa   :  { %110 = vsyncadd [#allocation4], 4294967280 }
   0xb   :  { %22 = sfence }
   0xc   :  { %v23_v0 = vld [vmem:[%s160_s1] sm:$0x1]  ;;  %s114_s21 = smov 127   ;;  %s115_s22 = smov 1   ;;  %v24_v1 = vlaneseq }
   0xd   :  { %28 = vrot.lane.b32.xlu0 %v23_v0, %s114_s21  ;;  %s33_s23 = sld [smem:[#allocation2]]  ;;  %s68_s24 = sld [smem:[#allocation2 + $0x1]] }
   0xe   :  { %v25_v2 = vand.u32 127, %v24_v1  ;;  %s69_s25 = sld [smem:[#allocation2 + $0x2]]  ;;  %s70_s26 = sld [smem:[#allocation2 + $0x3]] }
   0xf   :  { %s71_s27 = sld [smem:[#allocation2 + $0x4]]  ;;  %s72_s0 = sld [smem:[#allocation2 + $0x5]] }
  0x10   :  { %v26_v3 = vand.u32 1, %v25_v2  ;;  %s116_s1 = smov [#allocation5]  }
  0x11   :  { %30 = vrot.lane.b32.xlu0 %v23_v0, %s115_s22  ;;  %s59_s28 = sshll.u32 %s116_s1, 4  ;;  %s60_s28 = int_to_ptr.vmem [resolvable:$true] %s59_s28 }
  0x12   :  { %vm27_vm0 = vcmp.eq.s32.totalorder %v26_v3, 0  ;;  %s87_s29 = scalar_lea.vmem %s60_s28, 16  ;;  %s91_s30 = scalar_lea.vmem %s60_s28, 32 }
  0x13   :  { %v35_v4 = vstv %s33_s23  ;;  %v36_v5 = vstv %s68_s24  ;;  %p88_p3 = scmp.ne.s32.totalorder %s60_s28, %s87_s29  ;;  %p92_p4 = scmp.lt.s32.totalorder %s60_s28, %s60_s28 }
  0x14   :  { %v40_v7 = vstv %s69_s25  ;;  %v41_v8 = vstv %s70_s26  ;;  %v37_v9 = vsel %vm27_vm0, %v35_v4, %v36_v5  ;;  %p93_p5 = scmp.lt.s32.totalorder %s91_s30, %s87_s29 }
  0x15   :  { %v42_v10 = vsel %vm27_vm0, %v40_v7, %v41_v8  ;;  %v48_v11 = vmul.f32 %v37_v9, %v23_v0  ;;  %v45_v13 = vstv %s71_s27  ;;  %v46_v14 = vstv %s72_s0 }
  0x16   :  { %v47_v17 = vsel %vm27_vm0, %v45_v13, %v46_v14  ;;  %p94_p6 = por %p93_p5, %p92_p4 }
  0x18   :  { %p95_p7 = pnand %p94_p6, %p88_p3 }
  0x7f   :  { %v29_v6 = vpop.permute.xlu0 %28 }
  0x83   :  { %v31_v12 = vpop.permute.xlu0 %30 }
  0x84   :  { %v32_v15 = vsel %vm27_vm0, %v29_v6, %v31_v12 }
  0x85   :  { %v49_v16 = vmul.f32 %v42_v10, %v32_v15 }
  0x87   :  { %v50_v18 = vadd.f32 %v49_v16, %v48_v11 }
  0x89   :  { %v51_v19 = vadd.f32 %v50_v18, %v47_v17 }
  0x8b   :  { %52 = vst [vmem:[#allocation5] sm:$0x1] %v51_v19 }
  0x8c   :  { %98 = shalt.err (!%p95_p7)
}
  0x8d   :  { %s99_s5 = scalar_lea.hbm %s161_s2, 16 }
  0x8e   :  { %p100_p8 = scmp.ne.s32.totalorder %s161_s2, %s99_s5  ;;  %p103_p9 = scmp.lt.u32.totalorder %s99_s5, %s161_s2 }
  0x90   :  { %p105_p10 = pnand %p103_p9, %p100_p8 }
  0x92   :  { %108 = shalt.err (!%p105_p10)
}
  0x93   :  { %62 = dma.vmem_to_hbm [thread:$0]  %s60_s28, 16, %s161_s2, [#allocation3]  }
  0x94   :  { %111 = dma.done.wait [#allocation3], 16  }
  0x95   :  { %112 = vsyncadd [#allocation3], 4294967280 }
  0x96   :  { %66 = vsyncpa [#allocation3], 1 }
  0x97   :  { %67 = vsyncpa [#allocation4], 1 }

</bundles_post_ra>
